<compile_context>
chip_gen: v7x
topology: tpu7x:2x2x1
jax: 0.10.0
libtpu: 0.0.40
codegen_flags: <defaults>
</compile_context>

<pallas_src>
import functools

import jax
import jax.numpy as jnp
from jax.experimental import pallas as pl
from jax.experimental.pallas import tpu as pltpu

_MiB = 1024 * 1024


def _pick_tile(dim, max_tile):
    """Largest legal tile: the (aligned) max_tile, or the full dim if smaller."""
    return max_tile if dim > max_tile else dim


def _vmem_limit(bytes_needed):
    """Honest scoped-VMEM budget: 2x actual need, clamped to [16, 48] MiB
    (leaves headroom under v7x's 64 MiB physical VMEM per TensorCore)."""
    return int(min(48 * _MiB, max(16 * _MiB, 2 * bytes_needed)))


# ----------------------------------------------------------------------------
# Kernel A: raw hidden states.  B*T collapsed into M; z = x @ W + b.
#   * x stays f32 in HBM; cast to bf16 in-kernel (VPU cast hidden under MXU).
#   * output stored in bf16 -> halves the dominant HBM write stream.
# ----------------------------------------------------------------------------
def _encode_kernel(x_ref, w_ref, b_ref, z_ref, *, compute_dtype):
    x = x_ref[...].astype(compute_dtype)                       # (tm, Din) bf16
    h = jnp.dot(x, w_ref[...], preferred_element_type=jnp.float32)
    z_ref[...] = (h + b_ref[...]).astype(z_ref.dtype)


# ----------------------------------------------------------------------------
# Kernel B: fused encoder + time reduction (mean or max over dim=1).
#   grid = (batch tiles, D tiles, time tiles); time axis last + "arbitrary".
#   (bb, td) f32 accumulator scratch; init at t==0, finalize at t==last.
#   Partial time edge blocks (T % tt != 0) are masked AFTER the matmul so
#   garbage edge rows never reach the reduction.  Bias is added after the
#   reduction (constant over time -> legal for both mean and max).
# ----------------------------------------------------------------------------
def _fused_reduce_kernel(x_ref, w_ref, b_ref, o_ref, acc_ref, *,
                         t_true, tt, op, compute_dtype):
    t = pl.program_id(2)
    nt = pl.num_programs(2)
    pad_val = -jnp.inf if op == "max" else 0.0

    @pl.when(t == 0)
    def _init():
        acc_ref[...] = jnp.full_like(acc_ref, pad_val)

    bb = acc_ref.shape[0]
    for bi in range(bb):  # small static loop; each dot is (tt, Din) @ (Din, td)
        h = jnp.dot(x_ref[bi].astype(compute_dtype), w_ref[...],
                    preferred_element_type=jnp.float32)        # (tt, td) f32
        if t_true % tt != 0:   # static guard: mask garbage rows of edge block
            r = t * tt + jax.lax.broadcasted_iota(jnp.int32, h.shape, 0)
            h = jnp.where(r < t_true, h, pad_val)
        if op == "max":
            red = jnp.max(h, axis=0, keepdims=True)            # (1, td)
            acc_ref[pl.ds(bi, 1), :] = jnp.maximum(acc_ref[pl.ds(bi, 1), :], red)
        else:
            red = jnp.sum(h, axis=0, keepdims=True)            # (1, td)
            acc_ref[pl.ds(bi, 1), :] = acc_ref[pl.ds(bi, 1), :] + red

    @pl.when(t == nt - 1)
    def _finalize():
        if op == "max":
            res = acc_ref[...] + b_ref[...]
        else:
            res = acc_ref[...] * (1.0 / t_true) + b_ref[...]
        o_ref[...] = res.astype(o_ref.dtype)


# ----------------------------------------------------------------------------
# Wrapper mirroring Backbone.forward(x)
# ----------------------------------------------------------------------------
def backbone_forward(x, w, b, *, mean=False, pooling=False,
                     compute_dtype=jnp.bfloat16,
                     m_tile=512, time_tile=256, d_tile=256, batch_tile=8):
    if pooling:
        assert mean is False, "If pooling, no average should be done."

    x = jnp.asarray(x, jnp.float32)         # x stays f32 in HBM; cast in-kernel
    B, T, Din = x.shape
    D = w.shape[-1]
    w_c = jnp.asarray(w, compute_dtype)     # weights cast once (small)
    b_c = jnp.asarray(b, jnp.float32).reshape(1, D)

    if mean or pooling:
        op = "mean" if mean else "max"
        bb = _pick_tile(B, batch_tile)      # sublane-dense output / acc rows
        tt = _pick_tile(T, time_tile)       # MXU M height per grid step
        td = _pick_tile(D, d_tile)          # D tiles -> parallel pts for v7x 2TC
        nb, nd, nt = pl.cdiv(B, bb), pl.cdiv(D, td), pl.cdiv(T, tt)

        need = (2 * bb * tt * Din * 4       # f32 x blocks (double-buffered)
                + 2 * Din * td * 2          # bf16 W block (dbuf fallback)
                + 2 * 2 * td * 4            # bias blocks
                + 2 * bb * td * 4           # f32 output blocks
                + bb * td * 4)              # accumulator scratch
        kernel = functools.partial(_fused_reduce_kernel, t_true=T, tt=tt,
                                   op=op, compute_dtype=compute_dtype)

        def call(single_buffer_w):
            # W / bias are never re-fetched along the time axis -> single-buffer.
            wk = {"pipeline_mode": pl.Buffered(1)} if single_buffer_w else {}
            return pl.pallas_call(
                kernel,
                out_shape=jax.ShapeDtypeStruct((B, D), jnp.float32),
                grid_spec=pltpu.PrefetchScalarGridSpec(
                    num_scalar_prefetch=0,
                    grid=(nb, nd, nt),
                    in_specs=[
                        pl.BlockSpec((bb, tt, Din),
                                     lambda bi, di, ti: (bi, ti, 0)),
                        pl.BlockSpec((Din, td),
                                     lambda bi, di, ti: (0, di), **wk),
                        pl.BlockSpec((1, td),
                                     lambda bi, di, ti: (0, di), **wk),
                    ],
                    out_specs=pl.BlockSpec((bb, td),
                                           lambda bi, di, ti: (bi, di)),
                    scratch_shapes=[pltpu.VMEM((bb, td), jnp.float32)],
                ),
                compiler_params=pltpu.CompilerParams(
                    dimension_semantics=("parallel", "parallel", "arbitrary"),
                    vmem_limit_bytes=_vmem_limit(need),
                ),
            )(x, w_c, b_c)

        try:
            return call(True)
        except Exception:   # pl.Buffered(1) unsupported here -> default dbuf
            return call(False)

    # Raw hidden states: collapse B*T into the matmul M axis (metadata-only
    # reshape — no HBM copy, no padding) and tile it with tm rows per step.
    M = B * T
    tm = _pick_tile(M, m_tile)
    nm = pl.cdiv(M, tm)
    x2 = x.reshape(M, Din)

    out_dtype = compute_dtype               # bf16 output halves the HBM write
    need = (2 * tm * Din * 4                # f32 x blocks
            + 2 * Din * D * 2               # bf16 W (dbuf fallback)
            + 2 * 2 * D * 4                 # bias
            + 2 * tm * D * 2)               # bf16 output blocks
    kernel = functools.partial(_encode_kernel, compute_dtype=compute_dtype)

    def call(single_buffer_w):
        wk = {"pipeline_mode": pl.Buffered(1)} if single_buffer_w else {}
        return pl.pallas_call(
            kernel,
            out_shape=jax.ShapeDtypeStruct((M, D), out_dtype),
            grid_spec=pltpu.PrefetchScalarGridSpec(
                num_scalar_prefetch=0,
                grid=(nm,),
                in_specs=[
                    pl.BlockSpec((tm, Din), lambda i: (i, 0)),
                    pl.BlockSpec((Din, D), lambda i: (0, 0), **wk),
                    pl.BlockSpec((1, D), lambda i: (0, 0), **wk),
                ],
                out_specs=pl.BlockSpec((tm, D), lambda i: (i, 0)),
            ),
            compiler_params=pltpu.CompilerParams(
                dimension_semantics=("parallel",),
                vmem_limit_bytes=_vmem_limit(need),
            ),
        )(x2, w_c, b_c)

    try:
        z = call(True)
    except Exception:
        z = call(False)
    return z.reshape(B, T, D)


if __name__ == "__main__":
    # Small shapes: batch=2, time=8 frames, input feature=32, hidden=32
    B, T, Din, D = 2, 8, 32, 32

    key = jax.random.PRNGKey(0)
    kx, kw, kb = jax.random.split(key, 3)
    x = jax.random.normal(kx, (B, T, Din), dtype=jnp.float32)
    w = jax.random.normal(kw, (Din, D), dtype=jnp.float32) * 0.05
    bias = jax.random.normal(kb, (D,), dtype=jnp.float32) * 0.01

    # mean=False, pooling=False -> raw hidden states (B, T, D)
    z = jax.block_until_ready(backbone_forward(x, w, bias))
    # mean=True                 -> torch.mean(z, dim=1)
    z_mean = jax.block_until_ready(backbone_forward(x, w, bias, mean=True))
    # pooling=True              -> max_pool1d over full time dim
    z_max = jax.block_until_ready(backbone_forward(x, w, bias, pooling=True))

    # Reference on bf16-cast operands (kernel does bf16 matmul, f32 accumulate).
    x_bf = x.astype(jnp.bfloat16).astype(jnp.float32)
    w_bf = w.astype(jnp.bfloat16).astype(jnp.float32)
    z_ref = jnp.einsum("btd,de->bte", x_bf, w_bf) + bias.reshape(1, 1, D)

    assert z.shape == (B, T, D)
    assert z_mean.shape == (B, D)
    assert z_max.shape == (B, D)
    # raw path stores bf16 -> looser tolerance
    assert jnp.allclose(z.astype(jnp.float32), z_ref, atol=3e-2, rtol=3e-2)
    assert jnp.allclose(z_mean, z_ref.mean(axis=1), atol=2e-3, rtol=2e-3)
    assert jnp.allclose(z_max, z_ref.max(axis=1), atol=2e-3, rtol=2e-3)

    # Exercise partial edge blocks and the in-kernel time mask (T % tt != 0,
    # M % tm != 0) with forced small tiles.
    T2 = 12
    x_e = jax.random.normal(jax.random.PRNGKey(1), (B, T2, Din), dtype=jnp.float32)
    z_e = jax.block_until_ready(backbone_forward(x_e, w, bias, m_tile=16))
    z_e_mean = jax.block_until_ready(
        backbone_forward(x_e, w, bias, mean=True, time_tile=8))
    z_e_max = jax.block_until_ready(
        backbone_forward(x_e, w, bias, pooling=True, time_tile=8))
    x_e_bf = x_e.astype(jnp.bfloat16).astype(jnp.float32)
    z_e_ref = jnp.einsum("btd,de->bte", x_e_bf, w_bf) + bias.reshape(1, 1, D)
    assert jnp.allclose(z_e.astype(jnp.float32), z_e_ref, atol=3e-2, rtol=3e-2)
    assert jnp.allclose(z_e_mean, z_e_ref.mean(axis=1), atol=2e-3, rtol=2e-3)
    assert jnp.allclose(z_e_max, z_e_ref.max(axis=1), atol=2e-3, rtol=2e-3)

    print("KERNEL_OK")
</pallas_src>

<mosaic_0001>
module attributes {stable_mosaic.version = 11 : i64} {
  func.func @_encode_kernel(%arg0: i32, %arg1: memref<16x32xf32, #tpu.memory_space<vmem>>, %arg2: memref<32x32xbf16, #tpu.memory_space<vmem>>, %arg3: memref<1x32xf32, #tpu.memory_space<vmem>>, %arg4: memref<16x32xbf16, #tpu.memory_space<vmem>>) attributes {dimension_semantics = [#tpu.dimension_semantics<parallel>], iteration_bounds = array<i64: 1>, scalar_prefetch = 0 : i64, scratch_operands = 0 : i64, tpu.core_type = #tpu.core_type<tc>, window_params = [{transform_indices = @transform_0, window_bounds = array<i64: 16, 32>}, {pipeline_mode = #tpu.pipeline_mode<synchronous>, transform_indices = @transform_1, window_bounds = array<i64: 32, 32>}, {pipeline_mode = #tpu.pipeline_mode<synchronous>, transform_indices = @transform_2, window_bounds = array<i64: 1, 32>}, {transform_indices = @transform_3, window_bounds = array<i64: 16, 32>}]} {
    %c0 = arith.constant 0 : index
    %c0_0 = arith.constant 0 : index
    %0 = vector.load %arg1[%c0, %c0_0] : memref<16x32xf32, #tpu.memory_space<vmem>>, vector<16x32xf32>
    %1 = arith.truncf %0 : vector<16x32xf32> to vector<16x32xbf16>
    %c0_1 = arith.constant 0 : index
    %c0_2 = arith.constant 0 : index
    %2 = vector.load %arg2[%c0_1, %c0_2] : memref<32x32xbf16, #tpu.memory_space<vmem>>, vector<32x32xbf16>
    %cst = arith.constant dense<0.000000e+00> : vector<16x32xf32>
    %3 = tpu.matmul %1, %2, %cst {dimension_numbers = #tpu.dot_dimension_numbers<[1], [0], [0], [1], [0, 0, 1, 1], [], []>} : vector<16x32xbf16>, vector<32x32xbf16>, vector<16x32xf32> -> vector<16x32xf32>
    %c0_3 = arith.constant 0 : index
    %c0_4 = arith.constant 0 : index
    %4 = vector.load %arg3[%c0_3, %c0_4] : memref<1x32xf32, #tpu.memory_space<vmem>>, vector<1x32xf32>
    %5 = vector.broadcast %4 : vector<1x32xf32> to vector<16x32xf32>
    %6 = arith.addf %3, %5 : vector<16x32xf32>
    %7 = arith.truncf %6 : vector<16x32xf32> to vector<16x32xbf16>
    %c0_5 = arith.constant 0 : index
    %c0_6 = arith.constant 0 : index
    %8 = vector.load %arg4[%c0_5, %c0_6] : memref<16x32xbf16, #tpu.memory_space<vmem>>, vector<16x32xbf16>
    tpu.vector_store %arg4[%c0_5, %c0_6], %7 {strides = array<i32>} : memref<16x32xbf16, #tpu.memory_space<vmem>>, vector<16x32xbf16>,
    return
  }
  func.func @transform_0(%arg0: i32) -> (i32, i32) {
    %c0_i32 = arith.constant 0 : i32
    %c0_i32_0 = arith.constant 0 : i32
    return %arg0, %c0_i32 : i32, i32
  }
  func.func @transform_1(%arg0: i32) -> (i32, i32) {
    %c0_i32 = arith.constant 0 : i32
    %c0_i32_0 = arith.constant 0 : i32
    %c0_i32_1 = arith.constant 0 : i32
    return %c0_i32, %c0_i32_0 : i32, i32
  }
  func.func @transform_2(%arg0: i32) -> (i32, i32) {
    %c0_i32 = arith.constant 0 : i32
    %c0_i32_0 = arith.constant 0 : i32
    %c0_i32_1 = arith.constant 0 : i32
    return %c0_i32, %c0_i32_0 : i32, i32
  }
  func.func @transform_3(%arg0: i32) -> (i32, i32) {
    %c0_i32 = arith.constant 0 : i32
    %c0_i32_0 = arith.constant 0 : i32
    return %arg0, %c0_i32 : i32, i32
  }
}

module attributes {stable_mosaic.version = 11 : i64} {
  func.func @_encode_kernel(%arg0: i32, %arg1: memref<16x32xf32, #tpu.memory_space<vmem>>, %arg2: memref<32x32xbf16, #tpu.memory_space<vmem>>, %arg3: memref<1x32xf32, #tpu.memory_space<vmem>>, %arg4: memref<16x32xbf16, #tpu.memory_space<vmem>>) attributes {dimension_semantics = [#tpu.dimension_semantics<parallel>], iteration_bounds = array<i64: 1>, scalar_prefetch = 0 : i64, scratch_operands = 0 : i64, tpu.core_type = #tpu.core_type<tc>, window_params = [{transform_indices = @transform_0, window_bounds = array<i64: 16, 32>}, {pipeline_mode = #tpu.pipeline_mode<synchronous>, transform_indices = @transform_1, window_bounds = array<i64: 32, 32>}, {pipeline_mode = #tpu.pipeline_mode<synchronous>, transform_indices = @transform_2, window_bounds = array<i64: 1, 32>}, {transform_indices = @transform_3, window_bounds = array<i64: 16, 32>}]} {
    %c0 = arith.constant 0 : index
    %c0_0 = arith.constant 0 : index
    %0 = vector.load %arg1[%c0, %c0_0] : memref<16x32xf32, #tpu.memory_space<vmem>>, vector<16x32xf32>
    %1 = arith.truncf %0 : vector<16x32xf32> to vector<16x32xbf16>
    %c0_1 = arith.constant 0 : index
    %c0_2 = arith.constant 0 : index
    %2 = vector.load %arg2[%c0_1, %c0_2] : memref<32x32xbf16, #tpu.memory_space<vmem>>, vector<32x32xbf16>
    %cst = arith.constant dense<0.000000e+00> : vector<16x32xf32>
    %3 = tpu.matmul %1, %2, %cst {dimension_numbers = #tpu.dot_dimension_numbers<[1], [0], [0], [1], [0, 0, 1, 1], [], []>} : vector<16x32xbf16>, vector<32x32xbf16>, vector<16x32xf32> -> vector<16x32xf32>
    %c0_3 = arith.constant 0 : index
    %c0_4 = arith.constant 0 : index
    %4 = vector.load %arg3[%c0_3, %c0_4] : memref<1x32xf32, #tpu.memory_space<vmem>>, vector<1x32xf32>
    %5 = vector.broadcast %4 : vector<1x32xf32> to vector<16x32xf32>
    %6 = arith.addf %3, %5 : vector<16x32xf32>
    %7 = arith.truncf %6 : vector<16x32xf32> to vector<16x32xbf16>
    %c0_5 = arith.constant 0 : index
    %c0_6 = arith.constant 0 : index
    %8 = vector.load %arg4[%c0_5, %c0_6] : memref<16x32xbf16, #tpu.memory_space<vmem>>, vector<16x32xbf16>
    tpu.vector_store %arg4[%c0_5, %c0_6], %7 {strides = array<i32>} : memref<16x32xbf16, #tpu.memory_space<vmem>>, vector<16x32xbf16>,
    return
  }
  func.func @transform_0(%arg0: i32) -> (i32, i32) {
    %c0_i32 = arith.constant 0 : i32
    %c0_i32_0 = arith.constant 0 : i32
    return %arg0, %c0_i32 : i32, i32
  }
  func.func @transform_1(%arg0: i32) -> (i32, i32) {
    %c0_i32 = arith.constant 0 : i32
    %c0_i32_0 = arith.constant 0 : i32
    %c0_i32_1 = arith.constant 0 : i32
    return %c0_i32, %c0_i32_0 : i32, i32
  }
  func.func @transform_2(%arg0: i32) -> (i32, i32) {
    %c0_i32 = arith.constant 0 : i32
    %c0_i32_0 = arith.constant 0 : i32
    %c0_i32_1 = arith.constant 0 : i32
    return %c0_i32, %c0_i32_0 : i32, i32
  }
  func.func @transform_3(%arg0: i32) -> (i32, i32) {
    %c0_i32 = arith.constant 0 : i32
    %c0_i32_0 = arith.constant 0 : i32
    return %arg0, %c0_i32 : i32, i32
  }
}

</mosaic_0001>

<bundles_post_ra>
// kernel: tpu_custom_call.1
= control target key start
LH: loop header
LB: loop body
LE: loop exit
PB: predicated region body
PF: predicated region fallthrough
CT: control target
= control target key end

     0   :  { %8 = vsyncpa [#allocation3], 0  ;;  %s320_s0 = inlined_call_operand.hbm [shape: f32[16,32], index: 0, kind: input, shape index: {}]   ;;  %s321_s1 = inlined_call_operand.hbm [shape: bf16[32,32], index: 1, kind: input, shape index: {}]   ;;  %s322_s2 = inlined_call_operand.vmem [shape: f32[1,32], index: 2, kind: input, shape index: {}]   ;;  %s323_s3 = inlined_call_operand.hbm [shape: bf16[16,32], index: 3, kind: output, shape index: {}]  }
   0x1   :  { %9 = vsyncpa [#allocation6], 0 }
   0x2   :  { %10 = vsyncpa [#allocation4], 0  ;;  %s246_s12 = smov [#allocation2]   ;;  %s174_s16 = scalar_lea.hbm %s320_s0, 256 }
   0x3   :  { %s16_s13 = sshll.u32 %s246_s12, 4  ;;  %p175_p0 = scmp.ne.s32.totalorder %s320_s0, %s174_s16  ;;  %s17_s13 = int_to_ptr.vmem [resolvable:$true] %s16_s13 }
   0x4   :  { %p178_p1 = scmp.lt.u32.totalorder %s174_s16, %s320_s0 }
   0x6   :  { %p180_p2 = pnand %p178_p1, %p175_p0 }
   0x8   :  { %183 = shalt.err (!%p180_p2)
}
   0x9   :  { %s184_s21 = scalar_lea.vmem %s17_s13, 256  ;;  %p189_p4 = scmp.lt.s32.totalorder %s17_s13, %s17_s13 }
   0xa   :  { %p185_p3 = scmp.ne.s32.totalorder %s17_s13, %s184_s21  ;;  %p190_p5 = scmp.lt.s32.totalorder %s184_s21, %s184_s21 }
   0xc   :  { %p191_p6 = por %p190_p5, %p189_p4 }
   0xe   :  { %p192_p7 = pnand %p191_p6, %p185_p3 }
  0x10   :  { %195 = shalt.err (!%p192_p7)
}
  0x11   :  { %s247_s22 = smov 128   ;;  %s248_s23 = smov 8  }
  0x12   :  { %22 = dma.hbm_to_vmem [thread:$0]  %s320_s0, 256, %s17_s13, [#allocation3], %s247_s22, %s247_s22, %s248_s23  }
  0x13   :  { %s249_s26 = smov [#allocation5]   ;;  %s196_s30 = scalar_lea.hbm %s321_s1, 256 }
  0x14   :  { %s28_s27 = sshll.u32 %s249_s26, 4  ;;  %p197_p8 = scmp.ne.s32.totalorder %s321_s1, %s196_s30  ;;  %s29_s27 = int_to_ptr.vmem [resolvable:$true] %s28_s27 }
  0x15   :  { %p200_p9 = scmp.lt.u32.totalorder %s196_s30, %s321_s1 }
  0x17   :  { %p202_p10 = pnand %p200_p9, %p197_p8 }
  0x19   :  { %205 = shalt.err (!%p202_p10)
}
  0x1a   :  { %s206_s8 = scalar_lea.vmem %s29_s27, 256  ;;  %p211_p12 = scmp.lt.s32.totalorder %s29_s27, %s29_s27 }
  0x1b   :  { %p207_p11 = scmp.ne.s32.totalorder %s29_s27, %s206_s8  ;;  %p212_p13 = scmp.lt.s32.totalorder %s206_s8, %s206_s8 }
  0x1d   :  { %p213_p0 = por %p212_p13, %p211_p12 }
  0x1f   :  { %p214_p1 = pnand %p213_p0, %p207_p11 }
  0x21   :  { %217 = shalt.err (!%p214_p1)
}
  0x22   :  { %s250_s0 = smov 64   ;;  %s251_s9 = smov 4  }
  0x23   :  { %34 = dma.hbm_to_vmem [thread:$0]  %s321_s1, 256, %s29_s27, [#allocation6], %s250_s0, %s250_s0, %s251_s9  }
  0x24   :  { %240 = dma.done.wait [#allocation3], 256  }
  0x25   :  { %241 = vsyncadd [#allocation3], 4294967040 }
  0x26   :  { %242 = dma.done.wait [#allocation6], 256  }
  0x27   :  { %243 = vsyncadd [#allocation6], 4294967040  ;;  %v252_v0 = vmov 0.0   ;;  %vm253_vm0 = vmmov 0   ;;  %v172_v1 = vld [vmem:[#allocation5] sm:$0xff]   ;;  %v173_v2 = vld [vmem:[#allocation5 + $0x8] sm:$0xff]  }
  0x28   :  { %155 = vmatprep.subr.bf16.mxu0 %v252_v0  ;;  %159 = vmatprep.mubr.msk.bf16.mxu0 %vm253_vm0, %v252_v0  ;;  %v44_v3 = vld [vmem:[#allocation2] sm:$0xff]  ;;  %v45_v4 = vld [vmem:[#allocation2 + $0x8] sm:$0xff]  ;;  %vm70_vm1 = vcmask 261120   ;;  %vm123_vm2 = vcmask 257024   ;;  %s254_s13 = smov [#allocation7]  }
  0x29   :  { %156 = vmatpush3.bf16.msra.mxu0 %v172_v1  ;;  %v46_v5 = vpack.c.bf16 %v45_v4, %v44_v3  ;;  %v144_v6 = vld [vmem:[%s322_s2] ss:$0 sm:$0xff]  ;;  %s131_s14 = sshll.u32 %s254_s13, 4  ;;  %s132_s14 = int_to_ptr.vmem [resolvable:$true] %s131_s14 }
  0x2a   :  { %157 = vmatprep.subr.bf16.mxu0 %v252_v0  ;;  %s218_s15 = scalar_lea.vmem %s132_s14, 128  ;;  %p223_p3 = scmp.lt.s32.totalorder %s132_s14, %s132_s14 }
  0x2b   :  { %p219_p2 = scmp.ne.s32.totalorder %s132_s14, %s218_s15  ;;  %p224_p4 = scmp.lt.s32.totalorder %s218_s15, %s218_s15 }
  0x2d   :  { %158 = vmatpush3.bf16.msra.mxu0 %v173_v2  ;;  %p225_p5 = por %p224_p4, %p223_p3 }
  0x2f   :  { %p226_p6 = pnand %p225_p5, %p219_p2 }
  0x30   :  { %160 = vmatmul.mubr.msk.bf16.vlgmr.msra.gmra.mrb[0].mxu0 %vm70_vm1, %v46_v5 }
 0x103   :  { %v108_v7 = vpop.f32.mrb[0].mxu0 }
 0x104   :  { %v109_v8 = vadd.f32 %v144_v6, %v108_v7  ;;  %v161_v9 = vpop.f32.mrb[1].mxu0 }
 0x105   :  { %v111_v10 = vpop.f32.mrb[2].mxu0 }
 0x106   :  { %v150_v11 = vpack.c.bf16 %v109_v8, %v109_v8  ;;  %v112_v12 = vadd.f32 %v144_v6, %v111_v10  ;;  %v162_v13 = vpop.f32.mrb[3].mxu0 }
 0x108   :  { %v151_v14 = vpack.c.bf16 %v112_v12, %v112_v12  ;;  %124 = vst.msk [vmem:[#allocation7] sm:$0xf] %vm123_vm2, %v150_v11 }
 0x10a   :  { %125 = vst.msk [vmem:[#allocation7 + $0x4] sm:$0xf] %vm123_vm2, %v151_v14 }
 0x10b   :  { %229 = shalt.err (!%p226_p6)
}
 0x10c   :  { %s230_s17 = scalar_lea.hbm %s323_s3, 128 }
 0x10d   :  { %p231_p7 = scmp.ne.s32.totalorder %s323_s3, %s230_s17  ;;  %p234_p8 = scmp.lt.u32.totalorder %s230_s17, %s323_s3 }
 0x10f   :  { %p236_p9 = pnand %p234_p8, %p231_p7 }
 0x111   :  { %239 = shalt.err (!%p236_p9)
}
 0x112   :  { %137 = dma.vmem_to_hbm [thread:$0]  %s132_s14, 128, %s323_s3, [#allocation4], %s250_s0, %s250_s0, %s251_s9  }
 0x113   :  { %244 = dma.done.wait [#allocation4], 128  }
 0x114   :  { %245 = vsyncadd [#allocation4], 4294967168 }
 0x115   :  { %141 = vsyncpa [#allocation3], 1 }
 0x116   :  { %142 = vsyncpa [#allocation6], 1 }
 0x117   :  { %143 = vsyncpa [#allocation4], 1 }

// kernel: tpu_custom_call.1
= control target key start
LH: loop header
LB: loop body
LE: loop exit
PB: predicated region body
PF: predicated region fallthrough
CT: control target
= control target key end

     0   :  { %8 = vsyncpa [#allocation3], 0  ;;  %s320_s0 = inlined_call_operand.hbm [shape: f32[16,32], index: 0, kind: input, shape index: {}]   ;;  %s321_s1 = inlined_call_operand.hbm [shape: bf16[32,32], index: 1, kind: input, shape index: {}]   ;;  %s322_s2 = inlined_call_operand.vmem [shape: f32[1,32], index: 2, kind: input, shape index: {}]   ;;  %s323_s3 = inlined_call_operand.hbm [shape: bf16[16,32], index: 3, kind: output, shape index: {}]  }
   0x1   :  { %9 = vsyncpa [#allocation6], 0 }
   0x2   :  { %10 = vsyncpa [#allocation4], 0  ;;  %s246_s12 = smov [#allocation2]   ;;  %s174_s16 = scalar_lea.hbm %s320_s0, 256 }
   0x3   :  { %s16_s13 = sshll.u32 %s246_s12, 4  ;;  %p175_p0 = scmp.ne.s32.totalorder %s320_s0, %s174_s16  ;;  %s17_s13 = int_to_ptr.vmem [resolvable:$true] %s16_s13 }
   0x4   :  { %p178_p1 = scmp.lt.u32.totalorder %s174_s16, %s320_s0 }
   0x6   :  { %p180_p2 = pnand %p178_p1, %p175_p0 }
   0x8   :  { %183 = shalt.err (!%p180_p2)
}
   0x9   :  { %s184_s21 = scalar_lea.vmem %s17_s13, 256  ;;  %p189_p4 = scmp.lt.s32.totalorder %s17_s13, %s17_s13 }
   0xa   :  { %p185_p3 = scmp.ne.s32.totalorder %s17_s13, %s184_s21  ;;  %p190_p5 = scmp.lt.s32.totalorder %s184_s21, %s184_s21 }
   0xc   :  { %p191_p6 = por %p190_p5, %p189_p4 }
   0xe   :  { %p192_p7 = pnand %p191_p6, %p185_p3 }
  0x10   :  { %195 = shalt.err (!%p192_p7)
}
  0x11   :  { %s247_s22 = smov 128   ;;  %s248_s23 = smov 8  }
  0x12   :  { %22 = dma.hbm_to_vmem [thread:$0]  %s320_s0, 256, %s17_s13, [#allocation3], %s247_s22, %s247_s22, %s248_s23  }
  0x13   :  { %s249_s26 = smov [#allocation5]   ;;  %s196_s30 = scalar_lea.hbm %s321_s1, 256 }
  0x14   :  { %s28_s27 = sshll.u32 %s249_s26, 4  ;;  %p197_p8 = scmp.ne.s32.totalorder %s321_s1, %s196_s30  ;;  %s29_s27 = int_to_ptr.vmem [resolvable:$true] %s28_s27 }
  0x15   :  { %p200_p9 = scmp.lt.u32.totalorder %s196_s30, %s321_s1 }
  0x17   :  { %p202_p10 = pnand %p200_p9, %p197_p8 }
  0x19   :  { %205 = shalt.err (!%p202_p10)
}
  0x1a   :  { %s206_s8 = scalar_lea.vmem %s29_s27, 256  ;;  %p211_p12 = scmp.lt.s32.totalorder %s29_s27, %s29_s27 }
  0x1b   :  { %p207_p11 = scmp.ne.s32.totalorder %s29_s27, %s206_s8  ;;  %p212_p13 = scmp.lt.s32.totalorder %s206_s8, %s206_s8 }
  0x1d   :  { %p213_p0 = por %p212_p13, %p211_p12 }
  0x1f   :  { %p214_p1 = pnand %p213_p0, %p207_p11 }
  0x21   :  { %217 = shalt.err (!%p214_p1)
}
  0x22   :  { %s250_s0 = smov 64   ;;  %s251_s9 = smov 4  }
  0x23   :  { %34 = dma.hbm_to_vmem [thread:$0]  %s321_s1, 256, %s29_s27, [#allocation6], %s250_s0, %s250_s0, %s251_s9  }
  0x24   :  { %240 = dma.done.wait [#allocation3], 256  }
  0x25   :  { %241 = vsyncadd [#allocation3], 4294967040 }
  0x26   :  { %242 = dma.done.wait [#allocation6], 256  }
  0x27   :  { %243 = vsyncadd [#allocation6], 4294967040  ;;  %v252_v0 = vmov 0.0   ;;  %vm253_vm0 = vmmov 0   ;;  %v172_v1 = vld [vmem:[#allocation5] sm:$0xff]   ;;  %v173_v2 = vld [vmem:[#allocation5 + $0x8] sm:$0xff]  }
  0x28   :  { %155 = vmatprep.subr.bf16.mxu0 %v252_v0  ;;  %159 = vmatprep.mubr.msk.bf16.mxu0 %vm253_vm0, %v252_v0  ;;  %v44_v3 = vld [vmem:[#allocation2] sm:$0xff]  ;;  %v45_v4 = vld [vmem:[#allocation2 + $0x8] sm:$0xff]  ;;  %vm70_vm1 = vcmask 261120   ;;  %vm123_vm2 = vcmask 257024   ;;  %s254_s13 = smov [#allocation7]  }
  0x29   :  { %156 = vmatpush3.bf16.msra.mxu0 %v172_v1  ;;  %v46_v5 = vpack.c.bf16 %v45_v4, %v44_v3  ;;  %v144_v6 = vld [vmem:[%s322_s2] ss:$0 sm:$0xff]  ;;  %s131_s14 = sshll.u32 %s254_s13, 4  ;;  %s132_s14 = int_to_ptr.vmem [resolvable:$true] %s131_s14 }
  0x2a   :  { %157 = vmatprep.subr.bf16.mxu0 %v252_v0  ;;  %s218_s15 = scalar_lea.vmem %s132_s14, 128  ;;  %p223_p3 = scmp.lt.s32.totalorder %s132_s14, %s132_s14 }
  0x2b   :  { %p219_p2 = scmp.ne.s32.totalorder %s132_s14, %s218_s15  ;;  %p224_p4 = scmp.lt.s32.totalorder %s218_s15, %s218_s15 }
  0x2d   :  { %158 = vmatpush3.bf16.msra.mxu0 %v173_v2  ;;  %p225_p5 = por %p224_p4, %p223_p3 }
  0x2f   :  { %p226_p6 = pnand %p225_p5, %p219_p2 }
  0x30   :  { %160 = vmatmul.mubr.msk.bf16.vlgmr.msra.gmra.mrb[0].mxu0 %vm70_vm1, %v46_v5 }
 0x103   :  { %v108_v7 = vpop.f32.mrb[0].mxu0 }
 0x104   :  { %v109_v8 = vadd.f32 %v144_v6, %v108_v7  ;;  %v161_v9 = vpop.f32.mrb[1].mxu0 }
 0x105   :  { %v111_v10 = vpop.f32.mrb[2].mxu0 }
 0x106   :  { %v150_v11 = vpack.c.bf16 %v109_v8, %v109_v8  ;;  %v112_v12 = vadd.f32 %v144_v6, %v111_v10  ;;  %v162_v13 = vpop.f32.mrb[3].mxu0 }
 0x108   :  { %v151_v14 = vpack.c.bf16 %v112_v12, %v112_v12  ;;  %124 = vst.msk [vmem:[#allocation7] sm:$0xf] %vm123_vm2, %v150_v11 }
 0x10a   :  { %125 = vst.msk [vmem:[#allocation7 + $0x4] sm:$0xf] %vm123_vm2, %v151_v14 }
 0x10b   :  { %229 = shalt.err (!%p226_p6)
}
 0x10c   :  { %s230_s17 = scalar_lea.hbm %s323_s3, 128 }
 0x10d   :  { %p231_p7 = scmp.ne.s32.totalorder %s323_s3, %s230_s17  ;;  %p234_p8 = scmp.lt.u32.totalorder %s230_s17, %s323_s3 }
 0x10f   :  { %p236_p9 = pnand %p234_p8, %p231_p7 }
 0x111   :  { %239 = shalt.err (!%p236_p9)
}
 0x112   :  { %137 = dma.vmem_to_hbm [thread:$0]  %s132_s14, 128, %s323_s3, [#allocation4], %s250_s0, %s250_s0, %s251_s9  }
 0x113   :  { %244 = dma.done.wait [#allocation4], 128  }
 0x114   :  { %245 = vsyncadd [#allocation4], 4294967168 }
 0x115   :  { %141 = vsyncpa [#allocation3], 1 }
 0x116   :  { %142 = vsyncpa [#allocation6], 1 }
 0x117   :  { %143 = vsyncpa [#allocation4], 1 }

</bundles_post_ra>
